<compile_context>
chip_gen: v7x
topology: tpu7x:2x2x1
jax: 0.10.0
libtpu: 0.0.40
codegen_flags: <defaults>
</compile_context>

<pallas_src>
import functools

import jax
import jax.numpy as jnp
from jax import lax
from jax.experimental import pallas as pl
from jax.experimental.pallas import tpu as pltpu

_LANES = 128
_SUBLANES = 8


def _min_sublane_multiple(dtype) -> int:
    """Minimum sublane tile for a dtype: 8 (32-bit), 16 (bf16), 32 (int8/bool)."""
    return max(_SUBLANES, (4 * _SUBLANES) // jnp.dtype(dtype).itemsize)


def _pow_static(base, gamma):
    """base ** gamma with VPU-only square-and-multiply for small integer gamma."""
    g = float(gamma)
    if g == 0.0:
        return jnp.ones_like(base)
    if g == 1.0:
        return base
    if g == round(g) and 0.0 < g <= 16.0:
        n = int(round(g))
        result, cur = None, base
        while n:
            if n & 1:
                result = cur if result is None else result * cur
            n >>= 1
            if n:
                cur = cur * cur
        return result
    return base ** g  # generic fallback (EUP exp + log)


def _focal_loss_kernel(x_ref, t_ref, o_ref, *, alpha, gamma, binary_targets,
                       block_rows, rows_valid, mask_last):
    """One (block_rows, 128) tile of focal loss folded into an (8,128) partial."""

    @pl.when(pl.program_id(1) == 0)
    def _init():
        o_ref[...] = jnp.zeros_like(o_ref)

    x = x_ref[...].astype(jnp.float32)
    t = t_ref[...].astype(jnp.float32)

    a = float(alpha)
    alpha_t = (1.0 - a) + t * (2.0 * a - 1.0)          # FMA form of the blend

    if binary_targets:
        # Hard {0,1} targets: z = (1-2t)*x, bce = softplus(z), 1-p_t = sigmoid(z)
        # = exp(z - softplus(z)): two exp + one log1p, no divide, no selects.
        z = x * (1.0 - 2.0 * t)
        e = jnp.exp(-jnp.abs(z))
        bce = jnp.maximum(z, 0.0) + jnp.log1p(e)        # softplus(z)
        one_minus_pt = jnp.exp(z - bce)                 # sigmoid(z)
    else:
        # General soft-target path (matches the PyTorch module exactly).
        e = jnp.exp(-jnp.abs(x))
        d = 1.0 + e
        r = pl.reciprocal(d, approx=True)               # cheap EUP vrcp
        r = r * (2.0 - d * r)                           # one Newton step (~f32)
        bce = jnp.maximum(x, 0.0) - x * t + jnp.log1p(e)
        probs = jnp.where(x >= 0.0, r, e * r)           # sigmoid(x)
        one_minus_pt = t + probs * (1.0 - 2.0 * t)      # == 1 - p_t (FMA form)

    focal = alpha_t * _pow_static(one_minus_pt, gamma) * bce

    def _accumulate(vals):
        # Fold (block_rows, 128) -> (8, 128) with vreg-wise VPU adds only.
        o_ref[...] += vals.reshape(-1, _SUBLANES, _LANES).sum(axis=0)

    if not mask_last:                                   # static: aligned case
        _accumulate(focal)
    else:
        step = pl.program_id(0) * pl.num_programs(1) + pl.program_id(1)
        r0 = step * block_rows
        is_partial = (r0 + block_rows) > rows_valid     # only the global last step

        @pl.when(is_partial)
        def _masked():
            rid = r0 + lax.broadcasted_iota(jnp.int32, focal.shape, 0)
            _accumulate(jnp.where(rid < rows_valid, focal, 0.0))

        @pl.when(jnp.logical_not(is_partial))
        def _full():
            _accumulate(focal)


def focal_loss(inputs, targets, alpha=0.25, gamma=2.0, reduction="mean", *,
               binary_targets=False, block_rows=4096, num_splits=2):
    """Pallas focal loss. inputs/targets: (B, C, H, W); returns scalar f32."""
    assert inputs.shape == targets.shape
    if reduction not in ("mean", "sum"):
        # TODO(synk): 'none' reduction (full per-element output) not implemented.
        raise NotImplementedError("Only 'mean' and 'sum' reductions supported.")

    n = int(inputs.size)
    sub = max(_min_sublane_multiple(inputs.dtype), _min_sublane_multiple(targets.dtype))

    rows_data = pl.cdiv(n, _LANES)
    rows_arr = pl.cdiv(rows_data, sub) * sub            # dtype-aware sublane round
    n_arr = rows_arr * _LANES

    block_rows = int(min(int(block_rows), rows_arr))
    block_rows = pl.cdiv(block_rows, sub) * sub          # multiple of the min tile

    blocks_needed = pl.cdiv(rows_arr, block_rows)
    # Snap num_splits to a divisor of the block count: no fully-OOB blocks ever,
    # and small inputs (e.g. the demo) collapse to a single split.
    ns = max(1, min(int(num_splits), blocks_needed))
    while blocks_needed % ns:
        ns -= 1
    blocks_per_split = blocks_needed // ns
    mask_last = (rows_arr % block_rows) != 0             # at most one partial block

    x = inputs.reshape(-1)
    t = targets.reshape(-1)
    pad = n_arr - n
    if pad:
        # Sentinel pad (logit=-100, target=0) contributes ~0 to the sum; only
        # needed when n is not a multiple of sub*128 (rare for detection maps).
        x = jnp.pad(x, (0, pad), constant_values=-100.0)
        t = jnp.pad(t, (0, pad), constant_values=0)
    x = x.reshape(rows_arr, _LANES)
    t = t.reshape(rows_arr, _LANES)

    kernel = functools.partial(
        _focal_loss_kernel, alpha=float(alpha), gamma=float(gamma),
        binary_targets=bool(binary_targets), block_rows=block_rows,
        rows_valid=rows_arr, mask_last=mask_last)

    partials = pl.pallas_call(
        kernel,
        out_shape=jax.ShapeDtypeStruct((ns * _SUBLANES, _LANES), jnp.float32),
        grid_spec=pltpu.PrefetchScalarGridSpec(
            num_scalar_prefetch=0,
            grid=(ns, blocks_per_split),
            in_specs=[
                pl.BlockSpec((block_rows, _LANES),
                             lambda c, i, bps=blocks_per_split: (c * bps + i, 0)),
                pl.BlockSpec((block_rows, _LANES),
                             lambda c, i, bps=blocks_per_split: (c * bps + i, 0)),
            ],
            # Lane-dense (8,128) per-split partial, resident across the inner
            # reduction axis (accumulator pattern).
            out_specs=pl.BlockSpec((_SUBLANES, _LANES), lambda c, i: (c, 0)),
        ),
        compiler_params=pltpu.CompilerParams(
            dimension_semantics=("parallel", "arbitrary"),
        ),
    )(x, t)

    total = jnp.sum(partials)
    if reduction == "mean":
        return total / jnp.float32(n)
    return total


def _focal_loss_ref(inputs, targets, alpha=0.25, gamma=2.0, reduction="mean"):
    x = inputs.astype(jnp.float32)
    t = targets.astype(jnp.float32)
    bce = jnp.maximum(x, 0.0) - x * t + jnp.log1p(jnp.exp(-jnp.abs(x)))
    probs = jax.nn.sigmoid(x)
    alpha_t = t * alpha + (1.0 - t) * (1.0 - alpha)
    p_t = t * probs + (1.0 - t) * (1.0 - probs)
    focal = alpha_t * (1.0 - p_t) ** gamma * bce
    return focal.mean() if reduction == "mean" else focal.sum()


if __name__ == "__main__":
    key = jax.random.PRNGKey(0)
    k1, k2, k3, k4 = jax.random.split(key, 4)

    # Primary shape from the module spec: (B, C, H, W) = (2, 4, 16, 16).
    B, C, H, W = 2, 4, 16, 16
    inputs = jax.random.normal(k1, (B, C, H, W), dtype=jnp.float32)   # logits
    targets = (jax.random.uniform(k2, (B, C, H, W)) > 0.5).astype(jnp.float32)

    ref = _focal_loss_ref(inputs, targets)

    # 1) Default soft-target path, mean reduction.
    loss = jax.block_until_ready(focal_loss(inputs, targets, alpha=0.25, gamma=2.0))
    assert jnp.allclose(loss, ref, rtol=1e-4, atol=1e-4), (loss, ref)

    # 2) Sum reduction.
    loss_sum = jax.block_until_ready(focal_loss(inputs, targets, reduction="sum"))
    ref_sum = _focal_loss_ref(inputs, targets, reduction="sum")
    assert jnp.allclose(loss_sum, ref_sum, rtol=1e-4, atol=1e-3), (loss_sum, ref_sum)

    # 3) Binary-target fast path (targets are hard {0,1} here).
    loss_bin = jax.block_until_ready(
        focal_loss(inputs, targets, binary_targets=True))
    assert jnp.allclose(loss_bin, ref, rtol=1e-4, atol=1e-4), (loss_bin, ref)

    # 4) Ragged last block: 3072 elements, block_rows=16 -> 2 splits, one
    #    partial block exercising the in-kernel row mask (no padding needed).
    inputs_r = jax.random.normal(k3, (1, 3, 32, 32), dtype=jnp.float32)
    targets_r = (jax.random.uniform(k4, (1, 3, 32, 32)) > 0.5).astype(jnp.float32)
    loss_r = jax.block_until_ready(
        focal_loss(inputs_r, targets_r, block_rows=16, num_splits=2))
    ref_r = _focal_loss_ref(inputs_r, targets_r)
    assert jnp.allclose(loss_r, ref_r, rtol=1e-4, atol=1e-4), (loss_r, ref_r)

    # 5) Reduced-precision inputs (bf16) exercising the dtype-aware sublane
    #    rounding + sentinel-pad path; kernel upcasts to f32 internally.
    inputs_b = inputs.astype(jnp.bfloat16)
    targets_b = targets.astype(jnp.bfloat16)
    loss_b = jax.block_until_ready(focal_loss(inputs_b, targets_b))
    ref_b = _focal_loss_ref(inputs_b, targets_b)
    assert jnp.allclose(loss_b, ref_b, rtol=1e-4, atol=1e-4), (loss_b, ref_b)

    print("KERNEL_OK")
</pallas_src>

<mosaic_0001>
module attributes {stable_mosaic.version = 11 : i64} {
  func.func @_focal_loss_kernel(%arg0: i32, %arg1: i32, %arg2: memref<16x128xf32, #tpu.memory_space<vmem>>, %arg3: memref<16x128xf32, #tpu.memory_space<vmem>>, %arg4: memref<8x128xf32, #tpu.memory_space<vmem>>) attributes {dimension_semantics = [#tpu.dimension_semantics<parallel>, #tpu.dimension_semantics<arbitrary>], iteration_bounds = array<i64: 1, 1>, scalar_prefetch = 0 : i64, scratch_operands = 0 : i64, tpu.core_type = #tpu.core_type<tc>, window_params = [{transform_indices = @transform_0, window_bounds = array<i64: 16, 128>}, {transform_indices = @transform_1, window_bounds = array<i64: 16, 128>}, {transform_indices = @transform_2, window_bounds = array<i64: 8, 128>}]} {
    %c0_i32 = arith.constant 0 : i32
    %0 = arith.cmpi eq, %arg1, %c0_i32 : i32
    %1 = arith.extui %0 : i1 to i32
    %c0_i32_0 = arith.constant 0 : i32
    %2 = arith.cmpi ne, %1, %c0_i32_0 : i32
    scf.if %2 {
      %cst_17 = arith.constant 0.000000e+00 : f32
      %44 = vector.broadcast %cst_17 : f32 to vector<8x128xf32>
      %c0_18 = arith.constant 0 : index
      %c0_19 = arith.constant 0 : index
      %45 = vector.load %arg4[%c0_18, %c0_19] : memref<8x128xf32, #tpu.memory_space<vmem>>, vector<8x128xf32>
      tpu.vector_store %arg4[%c0_18, %c0_19], %44 {strides = array<i32>} : memref<8x128xf32, #tpu.memory_space<vmem>>, vector<8x128xf32>,
    } else {
    }
    %c0 = arith.constant 0 : index
    %c0_1 = arith.constant 0 : index
    %3 = vector.load %arg2[%c0, %c0_1] : memref<16x128xf32, #tpu.memory_space<vmem>>, vector<16x128xf32>
    %c0_2 = arith.constant 0 : index
    %c0_3 = arith.constant 0 : index
    %4 = vector.load %arg3[%c0_2, %c0_3] : memref<16x128xf32, #tpu.memory_space<vmem>>, vector<16x128xf32>
    %cst = arith.constant -5.000000e-01 : f32
    %5 = vector.broadcast %cst : f32 to vector<16x128xf32>
    %6 = arith.mulf %4, %5 : vector<16x128xf32>
    %cst_4 = arith.constant 7.500000e-01 : f32
    %7 = vector.broadcast %cst_4 : f32 to vector<16x128xf32>
    %8 = arith.addf %7, %6 : vector<16x128xf32>
    %9 = math.absf %3 : vector<16x128xf32>
    %cst_5 = arith.constant 0.000000e+00 : f32
    %10 = vector.broadcast %cst_5 : f32 to vector<16x128xf32>
    %11 = arith.subf %10, %9 : vector<16x128xf32>
    %12 = math.exp %11 : vector<16x128xf32>
    %cst_6 = arith.constant 1.000000e+00 : f32
    %13 = vector.broadcast %cst_6 : f32 to vector<16x128xf32>
    %14 = arith.addf %13, %12 : vector<16x128xf32>
    %15 = tpu.reciprocal %14 {approx = true} : vector<16x128xf32> -> vector<16x128xf32>
    %16 = arith.mulf %14, %15 : vector<16x128xf32>
    %cst_7 = arith.constant 2.000000e+00 : f32
    %17 = vector.broadcast %cst_7 : f32 to vector<16x128xf32>
    %18 = arith.subf %17, %16 : vector<16x128xf32>
    %19 = arith.mulf %15, %18 : vector<16x128xf32>
    %cst_8 = arith.constant 0.000000e+00 : f32
    %20 = vector.broadcast %cst_8 : f32 to vector<16x128xf32>
    %21 = arith.maximumf %3, %20 : vector<16x128xf32>
    %22 = arith.mulf %3, %4 : vector<16x128xf32>
    %23 = arith.subf %21, %22 : vector<16x128xf32>
    %24 = math.log1p %12 : vector<16x128xf32>
    %25 = arith.addf %23, %24 : vector<16x128xf32>
    %cst_9 = arith.constant 0.000000e+00 : f32
    %26 = vector.broadcast %cst_9 : f32 to vector<16x128xf32>
    %27 = arith.cmpf oge, %3, %26 : vector<16x128xf32>
    %28 = arith.mulf %12, %19 : vector<16x128xf32>
    %29 = arith.select %27, %19, %28 : vector<16x128xi1>, vector<16x128xf32>
    %cst_10 = arith.constant 2.000000e+00 : f32
    %30 = vector.broadcast %cst_10 : f32 to vector<16x128xf32>
    %31 = arith.mulf %30, %4 : vector<16x128xf32>
    %cst_11 = arith.constant 1.000000e+00 : f32
    %32 = vector.broadcast %cst_11 : f32 to vector<16x128xf32>
    %33 = arith.subf %32, %31 : vector<16x128xf32>
    %34 = arith.mulf %29, %33 : vector<16x128xf32>
    %35 = arith.addf %4, %34 : vector<16x128xf32>
    %36 = arith.mulf %35, %35 : vector<16x128xf32>
    %37 = arith.mulf %8, %36 : vector<16x128xf32>
    %38 = arith.mulf %37, %25 : vector<16x128xf32>
    %c0_12 = arith.constant 0 : index
    %c0_13 = arith.constant 0 : index
    %39 = vector.load %arg4[%c0_12, %c0_13] : memref<8x128xf32, #tpu.memory_space<vmem>>, vector<8x128xf32>
    %40 = vector.shape_cast %38 : vector<16x128xf32> to vector<2x8x128xf32>
    %cst_14 = arith.constant dense<0.000000e+00> : vector<8x128xf32>
    %41 = vector.multi_reduction <add>, %40, %cst_14 [0] : vector<2x8x128xf32> to vector<8x128xf32>
    %42 = arith.addf %39, %41 : vector<8x128xf32>
    %c0_15 = arith.constant 0 : index
    %c0_16 = arith.constant 0 : index
    %43 = vector.load %arg4[%c0_15, %c0_16] : memref<8x128xf32, #tpu.memory_space<vmem>>, vector<8x128xf32>
    tpu.vector_store %arg4[%c0_15, %c0_16], %42 {strides = array<i32>} : memref<8x128xf32, #tpu.memory_space<vmem>>, vector<8x128xf32>,
    return
  }
  func.func @transform_0(%arg0: i32, %arg1: i32) -> (i32, i32) {
    %c1_i32 = arith.constant 1 : i32
    %0 = arith.muli %arg0, %c1_i32 : i32
    %1 = arith.addi %0, %arg1 : i32
    %c0_i32 = arith.constant 0 : i32
    %c0_i32_0 = arith.constant 0 : i32
    return %1, %c0_i32 : i32, i32
  }
  func.func @transform_1(%arg0: i32, %arg1: i32) -> (i32, i32) {
    %c1_i32 = arith.constant 1 : i32
    %0 = arith.muli %arg0, %c1_i32 : i32
    %1 = arith.addi %0, %arg1 : i32
    %c0_i32 = arith.constant 0 : i32
    %c0_i32_0 = arith.constant 0 : i32
    return %1, %c0_i32 : i32, i32
  }
  func.func @transform_2(%arg0: i32, %arg1: i32) -> (i32, i32) {
    %c0_i32 = arith.constant 0 : i32
    %c0_i32_0 = arith.constant 0 : i32
    return %arg0, %c0_i32 : i32, i32
  }
}

</mosaic_0001>

<bundles_post_ra>
// kernel: tpu_custom_call.1
= control target key start
LH: loop header
LB: loop body
LE: loop exit
PB: predicated region body
PF: predicated region fallthrough
CT: control target
= control target key end

     0   :  { %7 = vsyncpa [#allocation3], 0  ;;  %s301_s0 = inlined_call_operand.hbm [shape: f32[16,128], index: 0, kind: input, shape index: {}]   ;;  %s302_s1 = inlined_call_operand.hbm [shape: f32[16,128], index: 1, kind: input, shape index: {}]   ;;  %s303_s2 = inlined_call_operand.hbm [shape: f32[8,128], index: 2, kind: output, shape index: {}]  }
   0x1   :  { %8 = vsyncpa [#allocation6], 0 }
   0x2   :  { %9 = vsyncpa [#allocation4], 0  ;;  %s239_s9 = smov [#allocation2]   ;;  %s167_s13 = scalar_lea.hbm %s301_s0, 256 }
   0x3   :  { %s19_s10 = sshll.u32 %s239_s9, 4  ;;  %p168_p0 = scmp.ne.s32.totalorder %s301_s0, %s167_s13  ;;  %s20_s10 = int_to_ptr.vmem [resolvable:$true] %s19_s10 }
   0x4   :  { %p171_p1 = scmp.lt.u32.totalorder %s167_s13, %s301_s0 }
   0x6   :  { %p173_p2 = pnand %p171_p1, %p168_p0 }
   0x8   :  { %176 = shalt.err (!%p173_p2)
}
   0x9   :  { %s177_s18 = scalar_lea.vmem %s20_s10, 256  ;;  %p182_p4 = scmp.lt.s32.totalorder %s20_s10, %s20_s10 }
   0xa   :  { %p178_p3 = scmp.ne.s32.totalorder %s20_s10, %s177_s18  ;;  %p183_p5 = scmp.lt.s32.totalorder %s177_s18, %s177_s18 }
   0xc   :  { %p184_p6 = por %p183_p5, %p182_p4 }
   0xe   :  { %p185_p7 = pnand %p184_p6, %p178_p3 }
  0x10   :  { %188 = shalt.err (!%p185_p7)
}
  0x11   :  { %s240_s19 = smov 128   ;;  %s241_s20 = smov 8  }
  0x12   :  { %25 = dma.hbm_to_vmem [thread:$0]  %s301_s0, 256, %s20_s10, [#allocation3], %s240_s19, %s240_s19, %s241_s20  }
  0x13   :  { %s242_s23 = smov [#allocation5]   ;;  %s189_s27 = scalar_lea.hbm %s302_s1, 256 }
  0x14   :  { %s35_s24 = sshll.u32 %s242_s23, 4  ;;  %p190_p8 = scmp.ne.s32.totalorder %s302_s1, %s189_s27  ;;  %s36_s24 = int_to_ptr.vmem [resolvable:$true] %s35_s24 }
  0x15   :  { %p193_p9 = scmp.lt.u32.totalorder %s189_s27, %s302_s1 }
  0x17   :  { %p195_p10 = pnand %p193_p9, %p190_p8 }
  0x19   :  { %198 = shalt.err (!%p195_p10)
}
  0x1a   :  { %s199_s4 = scalar_lea.vmem %s36_s24, 256  ;;  %p204_p12 = scmp.lt.s32.totalorder %s36_s24, %s36_s24 }
  0x1b   :  { %p200_p11 = scmp.ne.s32.totalorder %s36_s24, %s199_s4  ;;  %p205_p13 = scmp.lt.s32.totalorder %s199_s4, %s199_s4 }
  0x1d   :  { %p206_p0 = por %p205_p13, %p204_p12 }
  0x1f   :  { %p207_p1 = pnand %p206_p0, %p200_p11 }
  0x21   :  { %210 = shalt.err (!%p207_p1)
}
  0x22   :  { %41 = dma.hbm_to_vmem [thread:$0]  %s302_s1, 256, %s36_s24, [#allocation6], %s240_s19, %s240_s19, %s241_s20  }
  0x23   :  { %233 = dma.done.wait [#allocation3], 256  }
  0x24   :  { %234 = vsyncadd [#allocation3], 4294967040 }
  0x25   :  { %235 = dma.done.wait [#allocation6], 256  }
  0x26   :  { %236 = vsyncadd [#allocation6], 4294967040  ;;  %v57_v0 = vld [vmem:[#allocation2] sm:$0xff]  ;;  %v58_v1 = vld [vmem:[#allocation2 + $0x8] sm:$0xff]  ;;  %s243_s1 = smov [#allocation7]  }
  0x27   :  { %v65_v2 = vand.u32 2147483647, %v57_v0  ;;  %v66_v3 = vand.u32 2147483647, %v58_v1  ;;  %v59_v12 = vld [vmem:[#allocation5] sm:$0xff]  ;;  %v60_v15 = vld [vmem:[#allocation5 + $0x8] sm:$0xff] }
  0x28   :  { %v61_v19 = vmul.f32 -0.5, %v59_v12  ;;  %v115_v21 = vmul.f32 2.0, %v59_v12  ;;  %v85_v23 = vmul.f32 %v59_v12, %v57_v0  ;;  %v116_v25 = vmul.f32 2.0, %v60_v15  ;;  %s139_s6 = sshll.u32 %s243_s1, 4  ;;  %s140_s6 = int_to_ptr.vmem [resolvable:$true] %s139_s6 }
  0x29   :  { %v67_v4 = vsub.f32 0.0, %v65_v2  ;;  %v68_v5 = vsub.f32 0.0, %v66_v3  ;;  %v83_v28 = vmax.f32 %v57_v0, 0.0  ;;  %v84_v33 = vmax.f32 %v58_v1, 0.0  ;;  %s211_s7 = scalar_lea.vmem %s140_s6, 128  ;;  %p216_p3 = scmp.lt.s32.totalorder %s140_s6, %s140_s6 }
  0x2a   :  { %v86_v34 = vmul.f32 %v60_v15, %v58_v1  ;;  %vm109_vm0 = vcmp.ge.f32.partialorder %v57_v0, 0.0  ;;  %vm110_vm1 = vcmp.ge.f32.partialorder %v58_v1, 0.0  ;;  %v117_v37 = vsub.f32 1.0, %v115_v21  ;;  %p212_p2 = scmp.ne.s32.totalorder %s140_s6, %s211_s7  ;;  %p217_p4 = scmp.lt.s32.totalorder %s211_s7, %s211_s7 }
  0x2b   :  { %v69_v6 = vmul.f32 1.442695, %v67_v4  ;;  %v71_v7 = vmul.f32 1.442695, %v68_v5  ;;  %v118_v41 = vsub.f32 1.0, %v116_v25  ;;  %v62_v46 = vmul.f32 -0.5, %v60_v15 }
  0x2c   :  { %v87_v48 = vsub.f32 %v83_v28, %v85_v23  ;;  %v88_v51 = vsub.f32 %v84_v33, %v86_v34  ;;  %v63_v54 = vadd.f32 0.75, %v61_v19  ;;  %p218_p5 = por %p217_p4, %p216_p3 }
  0x2d   :  { %155 = vpow2.f32 %v69_v6  ;;  %v64_v57 = vadd.f32 0.75, %v62_v46 }
  0x2e   :  { %157 = vpow2.f32 %v71_v7  ;;  %p219_p6 = pnand %p218_p5, %p212_p2 }
  0x37   :  { %v156_v8 = vpop.eup %155 }
  0x38   :  { %v158_v9 = vpop.eup %157  ;;  %v73_v10 = vadd.f32 1.0, %v156_v8  ;;  %v92_v13 = vmul.f32 -0.5, %v156_v8  ;;  %v95_v29 = vand.u32 2147483647, %v156_v8 }
  0x39   :  { %v74_v11 = vadd.f32 1.0, %v158_v9  ;;  %v101_v16 = vmul.f32 -0.5, %v158_v9  ;;  %v104_v35 = vand.u32 2147483647, %v158_v9 }
  0x3a   :  { %159 = vrcp.f32 %v73_v10  ;;  %v93_v24 = vadd.f32 1.0, %v92_v13  ;;  %vm283_vm2 = vcmp.lt.f32.partialorder %v95_v29, 0.0004427343 }
  0x3b   :  { %161 = vrcp.f32 %v74_v11  ;;  %v102_v30 = vadd.f32 1.0, %v101_v16  ;;  %vm105_vm3 = vcmp.lt.f32.partialorder %v104_v35, 0.0004427343 }
  0x3c   :  { %163 = vlog2.f32 %v73_v10  ;;  %v94_v39 = vmul.f32 %v156_v8, %v93_v24 }
  0x3d   :  { %165 = vlog2.f32 %v74_v11  ;;  %v103_v44 = vmul.f32 %v158_v9, %v102_v30 }
  0x44   :  { %v160_v14 = vpop.eup %159 }
  0x45   :  { %v162_v17 = vpop.eup %161  ;;  %v77_v18 = vmul.f32 %v160_v14, %v73_v10 }
  0x46   :  { %v78_v20 = vmul.f32 %v162_v17, %v74_v11  ;;  %v164_v26 = vpop.eup %163 }
  0x47   :  { %v79_v22 = vsub.f32 2.0, %v77_v18  ;;  %v166_v31 = vpop.eup %165  ;;  %v91_v38 = vmul.f32 0.6931472, %v164_v26 }
  0x48   :  { %v80_v27 = vsub.f32 2.0, %v78_v20  ;;  %v100_v43 = vmul.f32 0.6931472, %v166_v31 }
  0x49   :  { %v81_v32 = vmul.f32 %v160_v14, %v79_v22  ;;  %v97_v52 = vsel %vm283_vm2, %v94_v39, %v91_v38 }
  0x4a   :  { %v82_v36 = vmul.f32 %v162_v17, %v80_v27  ;;  %v106_v55 = vsel %vm105_vm3, %v103_v44, %v100_v43  ;;  %v107_v59 = vadd.f32 %v97_v52, %v87_v48 }
  0x4b   :  { %v111_v40 = vmul.f32 %v156_v8, %v81_v32  ;;  %v108_v61 = vadd.f32 %v106_v55, %v88_v51 }
  0x4c   :  { %v112_v45 = vmul.f32 %v158_v9, %v82_v36 }
  0x4d   :  { %v113_v47 = vsel %vm109_vm0, %v81_v32, %v111_v40 }
  0x4e   :  { %v114_v49 = vsel %vm110_vm1, %v82_v36, %v112_v45  ;;  %v119_v50 = vmul.f32 %v117_v37, %v113_v47 }
  0x4f   :  { %v120_v53 = vmul.f32 %v118_v41, %v114_v49 }
  0x50   :  { %v121_v56 = vadd.f32 %v119_v50, %v59_v12 }
  0x51   :  { %v122_v58 = vadd.f32 %v120_v53, %v60_v15 }
  0x52   :  { %v123_v60 = vmul.f32 %v121_v56, %v121_v56 }
  0x53   :  { %v124_v62 = vmul.f32 %v122_v58, %v122_v58 }
  0x54   :  { %v125_v63 = vmul.f32 %v123_v60, %v63_v54 }
  0x55   :  { %v126_v0 = vmul.f32 %v124_v62, %v64_v57 }
  0x56   :  { %v127_v1 = vmul.f32 %v125_v63, %v107_v59 }
  0x57   :  { %v128_v2 = vmul.f32 %v126_v0, %v108_v61 }
  0x59   :  { %v130_v3 = vadd.f32 %v128_v2, %v127_v1 }
  0x5b   :  { %132 = vst [vmem:[#allocation7] sm:$0xff] %v130_v3 }
  0x5c   :  { %222 = shalt.err (!%p219_p6)
}
  0x5d   :  { %s223_s10 = scalar_lea.hbm %s303_s2, 128 }
  0x5e   :  { %p224_p7 = scmp.ne.s32.totalorder %s303_s2, %s223_s10  ;;  %p227_p8 = scmp.lt.u32.totalorder %s223_s10, %s303_s2 }
  0x60   :  { %p229_p9 = pnand %p227_p8, %p224_p7 }
  0x62   :  { %232 = shalt.err (!%p229_p9)
}
  0x63   :  { %142 = dma.vmem_to_hbm [thread:$0]  %s140_s6, 128, %s303_s2, [#allocation4]  }
  0x64   :  { %237 = dma.done.wait [#allocation4], 128  }
  0x65   :  { %238 = vsyncadd [#allocation4], 4294967168 }
  0x66   :  { %146 = vsyncpa [#allocation3], 1 }
  0x67   :  { %147 = vsyncpa [#allocation6], 1 }
  0x68   :  { %148 = vsyncpa [#allocation4], 1 }

</bundles_post_ra>
